<compile_context>
chip_gen: v7x
topology: tpu7x:2x2x1
jax: 0.10.0
libtpu: 0.0.40
codegen_flags: <defaults>
</compile_context>

<pallas_src>
from functools import partial

import jax
import jax.numpy as jnp
from jax.experimental import pallas as pl
from jax.experimental.pallas import tpu as pltpu

TEMPERATURE = 0.1
EPS = 1e-12  # torch.nn.functional.normalize eps


# ----------------------------- Pallas kernel ------------------------------- #
def _info_nce_paired_kernel(q_ref, k_ref, neg_ref, out_ref, *, temperature):
    """One grid step = one negative block (one batch element's negatives).

    q_ref:   (1, L, Dp)  queries paired with this negative block
    k_ref:   (1, L, Dp)  positive keys for those queries
    neg_ref: (1, M, Dp)  the (un-replicated) negative block
    out_ref: (1, L, 1)   per-row losses
    """
    q = q_ref[0].astype(jnp.float32)      # [L, Dp]
    k = k_ref[0].astype(jnp.float32)      # [L, Dp]
    neg = neg_ref[0].astype(jnp.float32)  # [M, Dp]

    def inv_l2(x):
        # 1 / max(||x||, eps)  ==  rsqrt(max(sum(x^2), eps^2));  rsqrt -> EUP slot.
        return jax.lax.rsqrt(
            jnp.maximum(jnp.sum(x * x, axis=-1, keepdims=True), EPS * EPS))

    inv_t = 1.0 / temperature
    qn = q * (inv_l2(q) * inv_t)          # fold 1/temperature into the query
    kn = k * inv_l2(k)
    negn = neg * inv_l2(neg)

    # positive logit: row-wise dot(q, k)  (already temperature-scaled via qn)
    pos_logit = jnp.sum(qn * kn, axis=-1, keepdims=True)               # [L, 1]

    # negative logits through the MXU: contract D of [L, Dp] with D of [M, Dp]
    neg_logits = jax.lax.dot_general(
        qn, negn, (((1,), (1,)), ((), ())),
        preferred_element_type=jnp.float32)                            # [L, M]

    # cross entropy with label 0 (the positive column), numerically stable
    row_max = jnp.maximum(jnp.max(neg_logits, axis=-1, keepdims=True), pos_logit)
    sum_exp = jnp.exp(pos_logit - row_max) + jnp.sum(
        jnp.exp(neg_logits - row_max), axis=-1, keepdims=True)
    lse = jnp.log(sum_exp) + row_max                                   # [L, 1]
    out_ref[0] = lse - pos_logit                                       # [L, 1]


def info_nce_paired_pallas(q_r, k_r, neg, temperature=TEMPERATURE):
    """q_r, k_r: [N, L, Dp]; neg: [N, M, Dp]  -> per-row losses [N, L, 1]."""
    N, L, Dp = q_r.shape
    _, M, _ = neg.shape
    kern = partial(_info_nce_paired_kernel, temperature=temperature)
    return pl.pallas_call(
        kern,
        out_shape=jax.ShapeDtypeStruct((N, L, 1), jnp.float32),
        grid_spec=pltpu.PrefetchScalarGridSpec(
            num_scalar_prefetch=0,
            grid=(N,),
            in_specs=[
                pl.BlockSpec((1, L, Dp), lambda j: (j, 0, 0)),
                pl.BlockSpec((1, L, Dp), lambda j: (j, 0, 0)),
                pl.BlockSpec((1, M, Dp), lambda j: (j, 0, 0)),
            ],
            out_specs=pl.BlockSpec((1, L, 1), lambda j: (j, 0, 0)),
        ),
        compiler_params=pltpu.CompilerParams(
            dimension_semantics=("parallel",)),
    )(q_r, k_r, neg)


# ------------------------------ JAX glue ----------------------------------- #
def _closest_pos_sample(skip):
    """For each (n, i): smallest j > i with skip[n, j] == 0 (else 0)."""
    N, L = skip.shape
    big = jnp.float32(jnp.iinfo(skip.dtype).max)
    z = jnp.broadcast_to(jnp.arange(L, dtype=jnp.float32)[None, :], (N, L))
    z = jnp.where(skip != 0, big, z)                       # [N, L]
    b = jnp.arange(L, dtype=jnp.float32)[None, :, None]    # [1, L, 1] -> position i
    diff = z[:, None, :] - b                               # [N, L, L] : j - i (or big)
    diff = jnp.where(diff <= 0.0, big, diff)
    return jnp.argmin(diff, axis=2)                        # [N, L]


def get_negative_samples(a, skip):
    """a: [N, L, D] embeddings, skip: [N, L] int (0 = positive, 1 = negative/skipped).

    Returns the UN-replicated negative set n [N, L, D] (the kernel resolves the
    `tile(n, (L, 1, 1))` pairing through its grid) plus the flat queries / keys.
    """
    N, L, D = a.shape
    keys = a  # sessions is None -> keys = a

    idx = _closest_pos_sample(skip)                               # [N, L]

    neg_mask = (skip == 1)
    pos_mask = (skip == 0)
    not_last = jnp.arange(L)[None, :] < (L - 1)
    valid_pos = pos_mask & not_last

    n = jnp.where(neg_mask[:, :, None], keys, 0.0)                # [N, L, D]
    p = jnp.where(valid_pos[:, :, None], a, 0.0)                  # [N, L, D]
    gathered = jnp.take_along_axis(keys, idx[:, :, None], axis=1)  # keys[n, idx[n, i]]
    p_key = jnp.where(valid_pos[:, :, None], gathered, 0.0)       # [N, L, D]

    return n, p.reshape(-1, D), p_key.reshape(-1, D)


def skip_contrastive_loss(x, skips, temperature=TEMPERATURE):
    N, L, D = x.shape
    n, p_flat, pk_flat = get_negative_samples(x, skips)           # n: [N,L,D]

    # Paired InfoNCE pairs flat row s with negatives n[s % N].  Reorder queries
    # so rows sharing negative block j are contiguous: q_r[j, m] = p_flat[m*N + j].
    q_r = jnp.transpose(p_flat.reshape(L, N, D), (1, 0, 2))       # [N, L, D]
    k_r = jnp.transpose(pk_flat.reshape(L, N, D), (1, 0, 2))      # [N, L, D]

    # Zero-pad D to a lane-dense multiple of 128 (does not change norms / dots).
    Dp = ((D + 127) // 128) * 128
    if Dp != D:
        pad = ((0, 0), (0, 0), (0, Dp - D))
        q_r = jnp.pad(q_r, pad)
        k_r = jnp.pad(k_r, pad)
        n = jnp.pad(n, pad)

    per_row = info_nce_paired_pallas(q_r, k_r, n, temperature)    # [N, L, 1]
    # Mean over the *global* number of rows S = N * L (matches F.cross_entropy mean).
    return jnp.sum(per_row) / (N * L)


# -------------------------- pure-JAX reference ----------------------------- #
def _reference_loss(x, skips):
    N, L, D = x.shape
    n, q, k = get_negative_samples(x, skips)
    neg = jnp.tile(n, (L, 1, 1))                                  # [L*N, L, D]

    def l2n(v):
        return v / jnp.maximum(jnp.linalg.norm(v, axis=-1, keepdims=True), EPS)

    qn, kn, negn = l2n(q), l2n(k), l2n(neg)
    pos = jnp.sum(qn * kn, axis=-1, keepdims=True)
    negl = jnp.einsum('sd,smd->sm', qn, negn)
    logits = jnp.concatenate([pos, negl], axis=1) / TEMPERATURE
    lse = jax.scipy.special.logsumexp(logits, axis=1)
    return jnp.mean(lse - logits[:, 0])


if __name__ == "__main__":
    N, L, D = 2, 8, 32  # batch, session_length, embedding_dim
    key = jax.random.PRNGKey(0)
    kx, ks = jax.random.split(key)
    x = jax.random.normal(kx, (N, L, D), dtype=jnp.float32)
    skips = jax.random.randint(ks, (N, L), 0, 2, dtype=jnp.int32)

    loss = jax.block_until_ready(skip_contrastive_loss(x, skips))
    ref = jax.block_until_ready(_reference_loss(x, skips))

    assert jnp.isfinite(loss), "loss is not finite"
    assert jnp.allclose(loss, ref, rtol=1e-4, atol=1e-4), (loss, ref)

    print("KERNEL_OK")
</pallas_src>

<mosaic_0001>
module attributes {stable_mosaic.version = 11 : i64} {
  func.func @_info_nce_paired_kernel(%arg0: i32, %arg1: memref<1x8x128xf32, #tpu.memory_space<vmem>>, %arg2: memref<1x8x128xf32, #tpu.memory_space<vmem>>, %arg3: memref<1x8x128xf32, #tpu.memory_space<vmem>>, %arg4: memref<1x8x1xf32, #tpu.memory_space<vmem>>) attributes {dimension_semantics = [#tpu.dimension_semantics<parallel>], iteration_bounds = array<i64: 2>, scalar_prefetch = 0 : i64, scratch_operands = 0 : i64, tpu.core_type = #tpu.core_type<tc>, window_params = [{transform_indices = @transform_0, window_bounds = array<i64: 1, 8, 128>}, {transform_indices = @transform_1, window_bounds = array<i64: 1, 8, 128>}, {transform_indices = @transform_2, window_bounds = array<i64: 1, 8, 128>}, {transform_indices = @transform_3, window_bounds = array<i64: 1, 8, 1>}]} {
    %c0 = arith.constant 0 : index
    %c0_0 = arith.constant 0 : index
    %c0_1 = arith.constant 0 : index
    %0 = vector.load %arg1[%c0, %c0_0, %c0_1] : memref<1x8x128xf32, #tpu.memory_space<vmem>>, vector<1x8x128xf32>
    %1 = vector.shape_cast %0 : vector<1x8x128xf32> to vector<8x128xf32>
    %c0_2 = arith.constant 0 : index
    %c0_3 = arith.constant 0 : index
    %c0_4 = arith.constant 0 : index
    %2 = vector.load %arg2[%c0_2, %c0_3, %c0_4] : memref<1x8x128xf32, #tpu.memory_space<vmem>>, vector<1x8x128xf32>
    %3 = vector.shape_cast %2 : vector<1x8x128xf32> to vector<8x128xf32>
    %c0_5 = arith.constant 0 : index
    %c0_6 = arith.constant 0 : index
    %c0_7 = arith.constant 0 : index
    %4 = vector.load %arg3[%c0_5, %c0_6, %c0_7] : memref<1x8x128xf32, #tpu.memory_space<vmem>>, vector<1x8x128xf32>
    %5 = vector.shape_cast %4 : vector<1x8x128xf32> to vector<8x128xf32>
    %6 = arith.mulf %1, %1 : vector<8x128xf32>
    %cst = arith.constant dense<0.000000e+00> : vector<8xf32>
    %7 = vector.multi_reduction <add>, %6, %cst [1] : vector<8x128xf32> to vector<8xf32>
    %8 = vector.shape_cast %7 : vector<8xf32> to vector<8x1xf32>
    %cst_8 = arith.constant 1.000000e-24 : f32
    %9 = vector.broadcast %cst_8 : f32 to vector<8x1xf32>
    %10 = arith.maximumf %8, %9 : vector<8x1xf32>
    %11 = math.rsqrt %10 : vector<8x1xf32>
    %cst_9 = arith.constant 1.000000e+01 : f32
    %12 = vector.broadcast %cst_9 : f32 to vector<8x1xf32>
    %13 = arith.mulf %11, %12 : vector<8x1xf32>
    %14 = vector.broadcast %13 : vector<8x1xf32> to vector<8x128xf32>
    %15 = arith.mulf %1, %14 : vector<8x128xf32>
    %16 = arith.mulf %3, %3 : vector<8x128xf32>
    %cst_10 = arith.constant dense<0.000000e+00> : vector<8xf32>
    %17 = vector.multi_reduction <add>, %16, %cst_10 [1] : vector<8x128xf32> to vector<8xf32>
    %18 = vector.shape_cast %17 : vector<8xf32> to vector<8x1xf32>
    %cst_11 = arith.constant 1.000000e-24 : f32
    %19 = vector.broadcast %cst_11 : f32 to vector<8x1xf32>
    %20 = arith.maximumf %18, %19 : vector<8x1xf32>
    %21 = math.rsqrt %20 : vector<8x1xf32>
    %22 = vector.broadcast %21 : vector<8x1xf32> to vector<8x128xf32>
    %23 = arith.mulf %3, %22 : vector<8x128xf32>
    %24 = arith.mulf %5, %5 : vector<8x128xf32>
    %cst_12 = arith.constant dense<0.000000e+00> : vector<8xf32>
    %25 = vector.multi_reduction <add>, %24, %cst_12 [1] : vector<8x128xf32> to vector<8xf32>
    %26 = vector.shape_cast %25 : vector<8xf32> to vector<8x1xf32>
    %cst_13 = arith.constant 1.000000e-24 : f32
    %27 = vector.broadcast %cst_13 : f32 to vector<8x1xf32>
    %28 = arith.maximumf %26, %27 : vector<8x1xf32>
    %29 = math.rsqrt %28 : vector<8x1xf32>
    %30 = vector.broadcast %29 : vector<8x1xf32> to vector<8x128xf32>
    %31 = arith.mulf %5, %30 : vector<8x128xf32>
    %32 = arith.mulf %15, %23 : vector<8x128xf32>
    %cst_14 = arith.constant dense<0.000000e+00> : vector<8xf32>
    %33 = vector.multi_reduction <add>, %32, %cst_14 [1] : vector<8x128xf32> to vector<8xf32>
    %34 = vector.shape_cast %33 : vector<8xf32> to vector<8x1xf32>
    %cst_15 = arith.constant dense<0.000000e+00> : vector<8x8xf32>
    %35 = tpu.matmul %15, %31, %cst_15 {dimension_numbers = #tpu.dot_dimension_numbers<[1], [1], [0], [0], [0, 0, 1, 0], [], []>} : vector<8x128xf32>, vector<8x128xf32>, vector<8x8xf32> -> vector<8x8xf32>
    %cst_16 = arith.constant dense<0xFF800000> : vector<8xf32>
    %36 = vector.multi_reduction <maximumf>, %35, %cst_16 [1] : vector<8x8xf32> to vector<8xf32>
    %37 = vector.shape_cast %36 : vector<8xf32> to vector<8x1xf32>
    %38 = arith.maximumf %37, %34 : vector<8x1xf32>
    %39 = arith.subf %34, %38 : vector<8x1xf32>
    %40 = math.exp %39 : vector<8x1xf32>
    %41 = vector.broadcast %38 : vector<8x1xf32> to vector<8x8xf32>
    %42 = arith.subf %35, %41 : vector<8x8xf32>
    %43 = math.exp %42 : vector<8x8xf32>
    %cst_17 = arith.constant dense<0.000000e+00> : vector<8xf32>
    %44 = vector.multi_reduction <add>, %43, %cst_17 [1] : vector<8x8xf32> to vector<8xf32>
    %45 = vector.shape_cast %44 : vector<8xf32> to vector<8x1xf32>
    %46 = arith.addf %40, %45 : vector<8x1xf32>
    %47 = math.log %46 : vector<8x1xf32>
    %48 = arith.addf %47, %38 : vector<8x1xf32>
    %49 = arith.subf %48, %34 : vector<8x1xf32>
    %c0_18 = arith.constant 0 : index
    %c0_19 = arith.constant 0 : index
    %c0_20 = arith.constant 0 : index
    %50 = vector.load %arg4[%c0_18, %c0_19, %c0_20] : memref<1x8x1xf32, #tpu.memory_space<vmem>>, vector<1x8x1xf32>
    %51 = vector.shape_cast %50 : vector<1x8x1xf32> to vector<8x1xf32>
    %52 = vector.shape_cast %49 : vector<8x1xf32> to vector<1x8x1xf32>
    tpu.vector_store %arg4[%c0_18, %c0_19, %c0_20], %52 {strides = array<i32>} : memref<1x8x1xf32, #tpu.memory_space<vmem>>, vector<1x8x1xf32>,
    return
  }
  func.func @transform_0(%arg0: i32) -> (i32, i32, i32) {
    %c0_i32 = arith.constant 0 : i32
    %c0_i32_0 = arith.constant 0 : i32
    %c0_i32_1 = arith.constant 0 : i32
    return %arg0, %c0_i32, %c0_i32_0 : i32, i32, i32
  }
  func.func @transform_1(%arg0: i32) -> (i32, i32, i32) {
    %c0_i32 = arith.constant 0 : i32
    %c0_i32_0 = arith.constant 0 : i32
    %c0_i32_1 = arith.constant 0 : i32
    return %arg0, %c0_i32, %c0_i32_0 : i32, i32, i32
  }
  func.func @transform_2(%arg0: i32) -> (i32, i32, i32) {
    %c0_i32 = arith.constant 0 : i32
    %c0_i32_0 = arith.constant 0 : i32
    %c0_i32_1 = arith.constant 0 : i32
    return %arg0, %c0_i32, %c0_i32_0 : i32, i32, i32
  }
  func.func @transform_3(%arg0: i32) -> (i32, i32, i32) {
    %c0_i32 = arith.constant 0 : i32
    %c0_i32_0 = arith.constant 0 : i32
    %c0_i32_1 = arith.constant 0 : i32
    return %arg0, %c0_i32, %c0_i32_0 : i32, i32, i32
  }
}

</mosaic_0001>

<bundles_post_ra>
// kernel: tpu_custom_call.1
= control target key start
LH: loop header
LB: loop body
LE: loop exit
PB: predicated region body
PF: predicated region fallthrough
CT: control target
= control target key end

     0   :  { %8 = vsyncpa [#allocation3], 0  ;;  %s911_s0 = inlined_call_operand.hbm [shape: f32[2,8,128], index: 0, kind: input, shape index: {}]   ;;  %s912_s1 = inlined_call_operand.hbm [shape: f32[2,8,128], index: 1, kind: input, shape index: {}]   ;;  %s913_s2 = inlined_call_operand.hbm [shape: f32[2,8,128], index: 2, kind: input, shape index: {}]   ;;  %s914_s3 = inlined_call_operand.vmem [shape: f32[2,8,1], index: 3, kind: output, shape index: {}]  }
   0x1   :  { %10 = vsyncpa [#allocation3 + $0x1], 0 }
   0x2   :  { %11 = vsyncpa [#allocation5], 0 }
   0x3   :  { %13 = vsyncpa [#allocation5 + $0x1], 0  ;;  %s722_s12 = smov 0   ;;  %s724_s13 = smov 0  }
   0x4   :  { %s726_s14 = smov 0   ;;  %s728_s15 = smov 0  }
   0x5 LB: > { %s741_s16 = sadd.s32 4294967295, %s695_s15   ;;  %s744_s17 = sadd.s32 1, %s695_s15   ;;  %s695_s15 = sphi %s728_s15, %s929_s15   ;;  %s691_s14 = sphi %s726_s14, %s928_s14   ;;  %s687_s13 = sphi %s724_s13, %s927_s13   ;;  %s683_s12 = sphi %s722_s12, %s926_s12  }
   0x6   : > { %s23_s18 = ssub.s32 %s695_s15, %s744_s17  ;;  %s26_s19 = sadd.s32 1, %s691_s14 }
   0x7   : > { %p24_p0 = scmp.eq.s32.totalorder %s23_s18, 0  ;;  %p33_p1 = scmp.ne.s32.totalorder %s691_s14, %s687_s13 }
   0x8   : > { %p34_p2 = scmp.eq.s32.totalorder %s695_s15, 0  ;;  %p39_p3 = scmp.ne.s32.totalorder %s687_s13, %s683_s12 }
   0x9   : > { %s754_s20 = scalar_select %p24_p0, %s691_s14, %s26_s19  }
   0xa   : > { %p35_p4 = por %p34_p2, %p33_p1  ;;  %p40_p5 = scmp.eq.s32.totalorder %s741_s16, 0 }
   0xb   : > { %p520_p6 = scmp.lt.s32.totalorder %s695_s15, 2  ;;  %s141_s22 = sand.u32 1, %s691_s14  }
   0xc   : > { %p758_p7 = por %p40_p5, %p39_p3  ;;  %s765_s23 = sshll.u32 %s141_s22, 3 }
   0xd   : > { %s768_s24 = sshll.u32 %s695_s15, 7  ;;  %p770_p8 = pnand %p520_p6, %p35_p4 }
   0xe   : > { %s917_s21 = scalar_select %p758_p7, 1, 0 }
   0xf   : > { %s918_s25 = scalar_select %p770_p8, 1, 0 }
  0x10   : > { %s159_s26 = sand.u32 1, %s695_s15   ;;  %s779_s29 = scalar_lea.hbm %s912_s1, %s768_s24 }
  0x11   : > { %s163_s30 = scalar_lea.vmem [#allocation4], %s765_s23  ;;  %s786_s5 = scalar_lea.sflag [#allocation5], %s159_s26 }
  0x12   : > { %s170_s4 = sshll.u32 %s163_s30, 4  ;;  %s567_s6 = scalar_lea.hbm %s779_s29, 128  ;;  %s783_s4 = int_to_ptr.vmem [resolvable:$true] %s170_s4 }
  0x13   : > { %p568_p11 = scmp.ne.s32.totalorder %s779_s29, %s567_s6  ;;  %p792_p12 = pneg %p770_p8 }
  0x14   : > { %s572_s10 = scalar_lea.hbm %s912_s1, 256  ;;  %p573_p1 = scmp.lt.u32.totalorder %s779_s29, %s912_s1 }
  0x15   : > { %p570_p13 = pnand %p792_p12, %p568_p11  ;;  %p574_p2 = scmp.lt.u32.totalorder %s572_s10, %s567_s6 }
  0x16   : > { %p576_p4 = scmp.lt.u32.totalorder %s567_s6, %s779_s29 }
  0x17   : > { %p571_p0 = pneg %p570_p13  ;;  %p575_p3 = por %p574_p2, %p573_p1 }
  0x19   : > { %p577_p5 = por %p576_p4, %p575_p3 }
  0x1b   : > { %p578_p6 = pnand %p577_p5, %p571_p0 }
  0x1d   : > { %581 = shalt.err (!%p578_p6)
}
  0x1e   : > { %s582_s18 = scalar_lea.vmem %s783_s4, 128  ;;  %s697_s19 = smov [#allocation4]  }
  0x1f   : > { %p583_p11 = scmp.ne.s32.totalorder %s783_s4, %s582_s18  ;;  %s587_s26 = sshll.u32 %s697_s19, 4  ;;  %s588_s26 = int_to_ptr.vmem [resolvable:$false] %s587_s26 }
  0x20   : > { %s589_s27 = scalar_lea.vmem %s588_s26, 256  ;;  %p590_p10 = scmp.lt.s32.totalorder %s783_s4, %s588_s26 }
  0x21   : > { %p585_p13 = pnand %p583_p11, %p792_p12  ;;  %p591_p7 = scmp.lt.s32.totalorder %s589_s27, %s582_s18 }
  0x23   : > { %p586_p9 = pneg %p585_p13  ;;  %p592_p1 = por %p591_p7, %p590_p10 }
  0x25   : > { %p593_p2 = pnand %p592_p1, %p586_p9 }
  0x27   : > { %596 = shalt.err (!%p593_p2)
}
  0x28   : > { %516 = dma.hbm_to_vmem [thread:$0]  (!%p770_p8), %s779_s29, 128, %s783_s4, %s786_s5  }
  0x29   : > { %p920_p0 = scmp.lt.s32.totalorder %s695_s15, 3  ;;  %p921_p3 = scmp.ge.s32.totalorder %s695_s15, 1 }
  0x2a   : > { %s828_s8 = scalar_lea.hbm %s911_s0, %s768_s24  ;;  %s145_s9 = scalar_lea.vmem [#allocation2], %s765_s23 }
  0x2b   : > { %p820_p4 = pnand %p921_p3, %p920_p0  ;;  %s152_s10 = sshll.u32 %s145_s9, 4  ;;  %s831_s10 = int_to_ptr.vmem [resolvable:$true] %s152_s10 }
  0x2c   : > { %s837_s15 = scalar_lea.hbm %s913_s2, %s768_s24  ;;  %s142_s11 = scalar_lea.sflag [#allocation3], %s141_s22 }
  0x2d   : > { %s922_s28 = scalar_select %p820_p4, 1, 0 }
  0x2e   : > { %s597_s12 = scalar_lea.hbm %s828_s8, 128  ;;  %s602_s26 = scalar_lea.hbm %s911_s0, 256 }
  0x2f   : > { %p598_p7 = scmp.ne.s32.totalorder %s828_s8, %s597_s12  ;;  %p603_p5 = scmp.lt.u32.totalorder %s828_s8, %s911_s0 }
  0x30   : > { %p604_p6 = scmp.lt.u32.totalorder %s602_s26, %s597_s12  ;;  %p606_p13 = scmp.lt.u32.totalorder %s597_s12, %s828_s8 }
  0x31   : > { %p600_p9 = pnand %p598_p7, %p792_p12 }
  0x32   : > { %p605_p11 = por %p604_p6, %p603_p5 }
  0x33   : > { %p601_p10 = pneg %p600_p9 }
  0x34   : > { %p607_p1 = por %p606_p13, %p605_p11 }
  0x36   : > { %p608_p2 = pnand %p607_p1, %p601_p10 }
  0x38   : > { %611 = shalt.err (!%p608_p2)
}
  0x39   : > { %s612_s22 = scalar_lea.vmem %s831_s10, 128  ;;  %s698_s24 = smov [#allocation2]  }
  0x3a   : > { %p613_p0 = scmp.ne.s32.totalorder %s831_s10, %s612_s22  ;;  %s617_s6 = sshll.u32 %s698_s24, 4  ;;  %s618_s6 = int_to_ptr.vmem [resolvable:$false] %s617_s6 }
  0x3b   : > { %s619_s9 = scalar_lea.vmem %s618_s6, 256  ;;  %p620_p9 = scmp.lt.s32.totalorder %s831_s10, %s618_s6 }
  0x3c   : > { %p615_p3 = pnand %p613_p0, %p792_p12  ;;  %p621_p4 = scmp.lt.s32.totalorder %s619_s9, %s612_s22 }
  0x3e   : > { %p616_p7 = pneg %p615_p3  ;;  %p622_p5 = por %p621_p4, %p620_p9 }
  0x40   : > { %p623_p6 = pnand %p622_p5, %p616_p7 }
  0x42   : > { %626 = shalt.err (!%p623_p6)
}
  0x43   : > { %513 = dma.hbm_to_vmem [thread:$0]  (!%p770_p8), %s828_s8, 128, %s831_s10, %s142_s11  }
  0x44   : > { %s181_s29 = scalar_lea.vmem [#allocation6], %s765_s23  ;;  %s627_s12 = scalar_lea.hbm %s837_s15, 128 }
  0x45   : > { %s188_s4 = sshll.u32 %s181_s29, 4  ;;  %p628_p10 = scmp.ne.s32.totalorder %s837_s15, %s627_s12  ;;  %s189_s4 = int_to_ptr.vmem [resolvable:$true] %s188_s4 }
  0x46   : > { %s632_s26 = scalar_lea.hbm %s913_s2, 256  ;;  %p633_p13 = scmp.lt.u32.totalorder %s837_s15, %s913_s2 }
  0x47   : > { %p630_p4 = pnand %p628_p10, %p792_p12  ;;  %p634_p1 = scmp.lt.u32.totalorder %s632_s26, %s627_s12 }
  0x48   : > { %p636_p0 = scmp.lt.u32.totalorder %s627_s12, %s837_s15 }
  0x49   : > { %p631_p11 = pneg %p630_p4  ;;  %p635_p2 = por %p634_p1, %p633_p13 }
  0x4b   : > { %p637_p3 = por %p636_p0, %p635_p2 }
  0x4d   : > { %p638_p7 = pnand %p637_p3, %p631_p11 }
  0x4f   : > { %641 = shalt.err (!%p638_p7)
}
  0x50   : > { %s642_s23 = scalar_lea.vmem %s189_s4, 128  ;;  %s699_s8 = smov [#allocation6]  }
  0x51   : > { %p643_p9 = scmp.ne.s32.totalorder %s189_s4, %s642_s23  ;;  %s647_s10 = sshll.u32 %s699_s8, 4  ;;  %s648_s10 = int_to_ptr.vmem [resolvable:$false] %s647_s10 }
  0x52   : > { %s649_s11 = scalar_lea.vmem %s648_s10, 256  ;;  %p650_p10 = scmp.lt.s32.totalorder %s189_s4, %s648_s10 }
  0x53   : > { %p645_p5 = pnand %p643_p9, %p792_p12  ;;  %p651_p4 = scmp.lt.s32.totalorder %s649_s11, %s642_s23 }
  0x55   : > { %p646_p6 = pneg %p645_p5  ;;  %p652_p8 = por %p651_p4, %p650_p10 }
  0x57   : > { %p653_p1 = pnand %p652_p8, %p646_p6 }
  0x59   : > { %656 = shalt.err (!%p653_p1)
}
  0x5a   : > { %p923_p13 = scmp.ne.s32.totalorder %s918_s25, 0  ;;  %p924_p11 = scmp.ne.s32.totalorder %s922_s28, 0 }
  0x5b   : > { %s199_s7 = sand.u32 (!%p924_p11), 1, %s687_s13   ;;  %p925_p12 = scmp.ne.s32.totalorder (!%p924_p11), %s917_s21, 0 }
  0x5c   : > { %519 = dma.hbm_to_vmem [thread:$0]  (!%p923_p13), %s837_s15, 128, %s189_s4, %s786_s5  }
  0x5d   : > { %197 = sbr.rel (%p924_p11) target bundleno = 806 (0x326), region = 32  ;;  %s491_s22 = sshll.u32 (!%p924_p11), %s199_s7, 3 }
  0x5e   : > { %s200_s24 = scalar_lea.sflag (!%p924_p11), [#allocation3], %s199_s7  ;;  %s203_s6 = scalar_lea.vmem (!%p924_p11), [#allocation2], %s491_s22 }
  0x64   : > { %674 = dma.done.wait (%p925_p12), %s200_s24, 128  }
  0x65   : > { %676 = vsyncadd (%p925_p12), %s200_s24, 4294967168  ;;  %s208_s25 = sand.u32 1, %s741_s16   ;;  %s212_s29 = scalar_lea.vmem [#allocation4], %s491_s22 }
  0x66   : > { %s209_s9 = scalar_lea.sflag [#allocation5], %s208_s25 }
  0x67   : > { %678 = dma.done.wait (%p925_p12), %s209_s9, 256  }
  0x68   : > { %680 = vsyncadd (%p925_p12), %s209_s9, 4294967040  ;;  %s221_s5 = scalar_lea.vmem [#allocation6], %s491_s22  ;;  %v257_v1 = vld [vmem:[%s203_s6] sm:$0xff]  ;;  %v258_v2 = vld [vmem:[%s212_s29] sm:$0xff]  ;;  %v700_v6 = vmov 0.0   ;;  %vm701_vm0 = vmmov 0  }
  0x69   : > { %v259_v0 = vld [vmem:[%s221_s5] sm:$0xff]  ;;  %v267_v4 = vmul.f32 %v258_v2, %v258_v2  ;;  %v260_v5 = vmul.f32 %v257_v1, %v257_v1  ;;  %499 = vmatprep.subr.mxu0 %v700_v6  ;;  %501 = vmatprep.mubr.msk.f32.mxu0 %vm701_vm0, %v700_v6  ;;  %vm352_vm1 = vcmask 64512   ;;  %p253_p8 = scmp.lt.s32.totalorder %s741_s16, 1  ;;  %vm371_vm2 = vcmask 7168  }
  0x6a   : > { %v273_v3 = vmul.f32 %v259_v0, %v259_v0 }
  0x6b   : > { %268 = vadd.xlane.f32.xlu1 %v267_v4  ;;  %s931_s16 = smov (!%p253_p8, %s741_s16), 1 }
  0x6c   : > { %274 = vadd.xlane.f32.xlu0 %v273_v3  ;;  %s494_s21 = sshll.u32 %s931_s16, 3 }
  0x6d   : > { %s256_s4 = scalar_lea.vmem %s914_s3, %s494_s21 }
  0x70   : > { %261 = vadd.xlane.f32.xlu0 %v260_v5 }
  0xf8   : > { %v269_v8 = vpop.xlane.xlu1 %268 }
  0xf9   : > { %v275_v7 = vpop.xlane.xlu0 %274  ;;  %v270_v10 = vmax.f32 %v269_v8, 1e-24 }
  0xfa   : > { %v276_v9 = vmax.f32 %v275_v7, 1e-24 }
  0xfc   : > { %555 = vrsqrt.f32 %v276_v9 }
  0xfd   : > { %v262_v11 = vpop.xlane.xlu0 %261  ;;  %557 = vrsqrt.f32 %v270_v10 }
  0xfe   : > { %v263_v12 = vmax.f32 %v262_v11, 1e-24 }
 0x100   : > { %559 = vrsqrt.f32 %v263_v12 }
 0x106   : > { %v556_v13 = vpop.eup %555 }
 0x107   : > { %v278_v14 = vmul.f32 %v556_v13, %v259_v0  ;;  %v558_v15 = vpop.eup %557 }
 0x108   : > { %v272_v18 = vmul.f32 %v558_v15, %v258_v2 }
 0x109   : > { %500 = vmatpush3.xpose.msra.mxu0 %v278_v14 }
 0x10a   : > { %v560_v16 = vpop.eup %559 }
 0x10b   : > { %v265_v17 = vmul.f32 10.0, %v560_v16 }
 0x10d   : > { %v266_v19 = vmul.f32 %v265_v17, %v257_v1 }
 0x10f   : > { %502 = vmatmul.mubr.f32.vlgmr.msra.gmra.mrb[0].mxu0 %v266_v19  ;;  %v279_v20 = vmul.f32 %v272_v18, %v266_v19 }
 0x111   : > { %280 = vadd.xlane.f32.xlu1 %v279_v20 }
 0x19e   : > { %v281_v24 = vpop.xlane.xlu1 %280 }
 0x1e2   : > { %v348_v21 = vpop.f32.mrb[0].mxu0 }
 0x1e3   : > { %v503_v22 = vpop.f32.mrb[1].mxu0  ;;  %v353_v23 = vsel %vm352_vm1, %v348_v21, -inf }
 0x1e4   : > { %354 = vmax.xlane.f32.xlu0 %v353_v23 }
 0x271   : > { %v355_v25 = vpop.xlane.xlu0 %354 }
 0x272   : > { %v356_v26 = vmax.f32 %v355_v25, %v281_v24 }
 0x274   : > { %v360_v27 = vsub.f32 %v348_v21, %v356_v26  ;;  %v357_v31 = vsub.f32 %v281_v24, %v356_v26 }
 0x276   : > { %v361_v28 = vmul.f32 1.442695, %v360_v27  ;;  %v358_v32 = vmul.f32 1.442695, %v357_v31 }
 0x278   : > { %561 = vpow2.f32 %v361_v28 }
 0x279   : > { %563 = vpow2.f32 %v358_v32 }
 0x282   : > { %v562_v29 = vpop.eup %561 }
 0x283   : > { %v363_v30 = vsel %vm352_vm1, %v562_v29, 0.0  ;;  %v564_v33 = vpop.eup %563 }
 0x284   : > { %364 = vadd.xlane.f32.xlu1 %v363_v30 }
 0x311   : > { %v365_v34 = vpop.xlane.xlu1 %364 }
 0x312   : > { %v366_v35 = vadd.f32 %v564_v33, %v365_v34 }
 0x314   : > { %565 = vlog2.f32 %v366_v35 }
 0x31e   : > { %v566_v36 = vpop.eup %565 }
 0x31f   : > { %v368_v37 = vmul.f32 0.6931472, %v566_v36 }
 0x321   : > { %v369_v38 = vadd.f32 %v368_v37, %v356_v26 }
 0x323   : > { %v370_v39 = vsub.f32 %v369_v38, %v281_v24 }
 0x325   : > { %372 = vst.msk [vmem:[%s256_s4] sm:$0xff] %vm371_vm2, %v370_v39 }
 0x326 PF: > { %p16_p2 = scmp.ge.s32.totalorder %s744_s17, 4   ;;  %s926_s12 = smov %s687_s13 }
 0x327   : > { %s927_s13 = smov %s691_s14  ;;  %s928_s14 = smov %s754_s20 }
 0x328   : > { %s929_s15 = smov %s744_s17  ;;  %18 = sbr.rel (!%p16_p2) target bundleno = 5 (0x5), region = 96 }
 0x32f   :  { %392 = vsyncpa [#allocation3], 1 }
 0x330   :  { %394 = vsyncpa [#allocation3 + $0x1], 1 }
 0x331   :  { %395 = vsyncpa [#allocation5], 1 }
 0x332   :  { %397 = vsyncpa [#allocation5 + $0x1], 1 }

</bundles_post_ra>
